<compile_context>
chip_gen: v5e
topology: v5e:2x2
jax: 0.10.0
libtpu: 0.0.40
codegen_flags: <defaults>
</compile_context>

<pallas_src>
import functools

import jax
import jax.numpy as jnp
from jax.experimental import pallas as pl
from jax.experimental.pallas import tpu as pltpu


def _sigmoid(x):
    # Exact sigmoid via a single EUP tanh (no approximate reciprocal in the
    # LSTM recurrence); the extra mul/add is free VPU filler.
    return 0.5 * jnp.tanh(0.5 * x) + 0.5


def attn_decoder_kernel(
    # activations (VMEM, batch-tiled)
    last_y_ref, last_o_ref, last_h_ref, last_c_ref, v_ref,
    # packed parameters (VMEM, whole arrays)
    emb_ref, attn_w_ref, w_gates_ref, wc_w_ref, wout_w_ref, bias_ref,
    # packed output (VMEM, batch-tiled, lane-dense)
    out_ref,
    # scratch
    x_scr_ref, hc_scr_ref,
    *, compute_dtype,
):
    Bt, S, H = v_ref.shape
    V, E = emb_ref.shape
    O = last_o_ref.shape[1]
    A = attn_w_ref.shape[1]
    cdt = compute_dtype

    def mdot(a, w):
        # MXU matmul at compute_dtype (f32 or bf16) with f32 accumulation.
        return jnp.dot(a.astype(cdt), w.astype(cdt),
                       preferred_element_type=jnp.float32)

    h_prev = last_h_ref[...]                          # (Bt, H)
    c_prev = last_c_ref[...]                          # (Bt, H)
    o_prev = last_o_ref[...]                          # (Bt, O)
    v3 = v_ref[...]                                   # (Bt, S, H)

    # Small vectors from the packed bias block (all lane-offset-0 row slices).
    b_gates = bias_ref[0:1, 0:4 * H]                  # (1, 4H)  = b_ih + b_hh
    b_o = bias_ref[1:2, 0:O]                          # (1, O)   = wc1_b + wc2_b
    wout_b = bias_ref[2:3, 0:V]                       # (1, V)
    attn_b = bias_ref[3:4, 0:A]                       # (1, A)   = wh_b + wv_b
    beta_w = bias_ref[4:5, 0:A]                       # (1, A)   (beta_b dropped:
                                                      #  softmax is shift invariant)

    # ---- Bahdanau attention, batched over Bt (and Bt*S for the projection) ----
    wh_h = mdot(h_prev, attn_w_ref[0:H, :])                               # (Bt, A)
    wv_v = mdot(v3.reshape(Bt * S, H), attn_w_ref[H:2 * H, :]) + attn_b   # (Bt*S, A)
    t = jnp.tanh(wv_v.reshape(Bt, S, A) + wh_h.reshape(Bt, 1, A))         # (Bt, S, A)
    # Scores (Bt, S): S on the lane axis -> cheap lane softmax.
    e = jnp.sum(t * beta_w.reshape(1, 1, A), axis=-1)                     # (Bt, S)
    m = jnp.max(e, axis=-1, keepdims=True)
    p = jnp.exp(e - m)
    alpha = p * pl.reciprocal(jnp.sum(p, axis=-1, keepdims=True), approx=True)
    # Context vector on the VPU/XLU (one weighted sum instead of Bt M=1 matmuls).
    c_ctx = jnp.sum(alpha[:, :, None] * v3, axis=1)                       # (Bt, H)

    # ---- embedding lookup as one-hot MXU matmul (no scalar loop) ----
    ids = last_y_ref[...]                                                 # (Bt, 1) i32
    iota = jax.lax.broadcasted_iota(jnp.int32, (Bt, V), 1)
    one_hot = (ids == iota).astype(cdt)                                   # (Bt, V)
    embedded = mdot(one_hot, emb_ref[...])                                # (Bt, E)

    # ---- single-step LSTM: one fused gate matmul (K = E+O+H) ----
    x_scr_ref[:, 0:E] = embedded
    x_scr_ref[:, E:E + O] = o_prev
    x_scr_ref[:, E + O:E + O + H] = h_prev
    gates = mdot(x_scr_ref[...], w_gates_ref[...]) + b_gates              # (Bt, 4H)
    i_g = _sigmoid(gates[:, 0:H])
    f_g = _sigmoid(gates[:, H:2 * H])
    g_g = jnp.tanh(gates[:, 2 * H:3 * H])
    out_g = _sigmoid(gates[:, 3 * H:4 * H])
    c_t = f_g * c_prev + i_g * g_g
    h_t = out_g * jnp.tanh(c_t)

    # ---- output projection (fused [h_t|c_ctx] @ [wc1;wc2]) + log_softmax ----
    hc_scr_ref[:, 0:H] = h_t
    hc_scr_ref[:, H:2 * H] = c_ctx
    o_t = jnp.tanh(mdot(hc_scr_ref[...], wc_w_ref[...]) + b_o)            # (Bt, O)
    logits = mdot(o_t, wout_w_ref[...]) + wout_b                          # (Bt, V)
    lm = jnp.max(logits, axis=-1, keepdims=True)
    z = logits - lm
    logprob = z - jnp.log(jnp.sum(jnp.exp(z), axis=-1, keepdims=True))

    # ---- single lane-dense packed output block: [logprob|o_t|h_t|c_t|pad] ----
    out_ref[:, 0:V] = logprob
    out_ref[:, V:V + O] = o_t
    out_ref[:, V + O:V + O + H] = h_t
    out_ref[:, V + O + H:V + O + 2 * H] = c_t
    pad = out_ref.shape[1] - (V + O + 2 * H)
    if pad > 0:
        out_ref[:, V + O + 2 * H:] = jnp.zeros((Bt, pad), jnp.float32)


# ---------------------------------------------------------------------------
# Parameters (torch-equivalent layout) + packing for the kernel.
# ---------------------------------------------------------------------------
def make_params(key, num_tokens, embedding_dim, hidden_dim, output_dim, attn_dim):
    keys = jax.random.split(key, 17)

    def init(k, shape, scale=0.1):
        return jax.random.normal(k, shape, jnp.float32) * scale

    return dict(
        emb=init(keys[0], (num_tokens, embedding_dim)),
        wh_w=init(keys[1], (hidden_dim, attn_dim)),
        wh_b=init(keys[2], (1, attn_dim)),
        wv_w=init(keys[3], (hidden_dim, attn_dim)),
        wv_b=init(keys[4], (1, attn_dim)),
        beta_w=init(keys[5], (1, attn_dim)),
        beta_b=init(keys[6], (1, 1)),
        w_ih=init(keys[7], (embedding_dim + output_dim, 4 * hidden_dim)),
        b_ih=init(keys[8], (1, 4 * hidden_dim)),
        w_hh=init(keys[9], (hidden_dim, 4 * hidden_dim)),
        b_hh=init(keys[10], (1, 4 * hidden_dim)),
        wc1_w=init(keys[11], (hidden_dim, output_dim)),
        wc1_b=init(keys[12], (1, output_dim)),
        wc2_w=init(keys[13], (hidden_dim, output_dim)),
        wc2_b=init(keys[14], (1, output_dim)),
        wout_w=init(keys[15], (output_dim, num_tokens)),
        wout_b=init(keys[16], (1, num_tokens)),
    )


PACKED_ORDER = ("emb", "attn_w", "w_gates", "wc_w", "wout_w", "bias_pack")


def pack_params(p):
    """Consolidate the 18 raw tensors into 6 lane/row-packed kernel inputs."""
    H = p["wh_w"].shape[0]
    A = p["wh_w"].shape[1]
    O = p["wc1_w"].shape[1]
    V = p["wout_w"].shape[1]
    width = max(4 * H, O, V, A)
    width = ((width + 127) // 128) * 128

    def pad_row(x):
        return jnp.pad(x, ((0, 0), (0, width - x.shape[1])))

    bias_pack = jnp.concatenate([
        pad_row(p["b_ih"] + p["b_hh"]),       # row 0: fused LSTM gate bias
        pad_row(p["wc1_b"] + p["wc2_b"]),     # row 1: o_t bias
        pad_row(p["wout_b"]),                 # row 2: vocab bias
        pad_row(p["wh_b"] + p["wv_b"]),       # row 3: attention bias
        pad_row(p["beta_w"]),                 # row 4: beta weight (beta_b dropped)
    ], axis=0)

    return dict(
        emb=p["emb"],                                               # (V, E)
        attn_w=jnp.concatenate([p["wh_w"], p["wv_w"]], axis=0),     # (2H, A)
        w_gates=jnp.concatenate([p["w_ih"], p["w_hh"]], axis=0),    # (E+O+H, 4H)
        wc_w=jnp.concatenate([p["wc1_w"], p["wc2_w"]], axis=0),     # (2H, O)
        wout_w=p["wout_w"],                                         # (O, V)
        bias_pack=bias_pack,                                        # (5, >=128)
    )


# ---------------------------------------------------------------------------
# Wrapper
# ---------------------------------------------------------------------------
def attn_decoder_forward(last_y, last_o, last_h, last_c, v, packed,
                         *, matmul_dtype=jnp.float32):
    """matmul_dtype=jnp.bfloat16 is recommended on v5e/v6e (f32 accumulation kept)."""
    B, S, H = v.shape
    V, E = packed["emb"].shape
    O = last_o.shape[1]
    Wout = V + O + 2 * H
    Wout_p = ((Wout + 127) // 128) * 128

    # Batch tiling: single grid step when small (v5e/v6e have one TensorCore so
    # extra steps are pure overhead); exactly two 8-aligned steps for large B so
    # v7x's two TensorCores each take one ("parallel" axis).
    if B >= 16 and B % 16 == 0:
        Bt = B // 2
    else:
        Bt = B
    grid = (B // Bt,)

    last_y2d = last_y.reshape(B, 1).astype(jnp.int32)
    kernel = functools.partial(attn_decoder_kernel, compute_dtype=matmul_dtype)
    param_args = [packed[name] for name in PACKED_ORDER]

    def act_spec(block):
        zeros = (0,) * (len(block) - 1)
        return pl.BlockSpec(block, lambda i, _z=zeros: (i,) + _z)

    def param_spec(arr):
        zeros = (0,) * arr.ndim
        return pl.BlockSpec(arr.shape, lambda i, _z=zeros: _z)

    grid_spec = pltpu.PrefetchScalarGridSpec(
        num_scalar_prefetch=0,
        grid=grid,
        in_specs=[act_spec((Bt, 1)),           # last_y (int32 ids, one-hot in kernel)
                  act_spec((Bt, O)),           # last_o
                  act_spec((Bt, H)),           # last_h
                  act_spec((Bt, H)),           # last_c_memory
                  act_spec((Bt, S, H))]        # v
                 + [param_spec(a) for a in param_args],
        out_specs=act_spec((Bt, Wout_p)),      # packed [logprob|o_t|h_t|c_t|pad]
        scratch_shapes=[pltpu.VMEM((Bt, E + O + H), jnp.float32),   # LSTM input
                        pltpu.VMEM((Bt, 2 * H), jnp.float32)],      # [h_t|c_ctx]
    )

    fn = pl.pallas_call(
        kernel,
        out_shape=jax.ShapeDtypeStruct((B, Wout_p), jnp.float32),
        grid_spec=grid_spec,
        compiler_params=pltpu.CompilerParams(
            dimension_semantics=("parallel",),
            vmem_limit_bytes=32 * 1024 * 1024),
    )
    out = fn(last_y2d, last_o, last_h, last_c, v, *param_args)

    prob = out[:, 0:V]
    o_t = out[:, V:V + O]
    h_t = out[:, V + O:V + O + H]
    c_t = out[:, V + O + H:V + O + 2 * H]
    return prob, o_t, h_t, c_t


# ---------------------------------------------------------------------------
# Pure-JAX reference replicating the PyTorch forward.
# ---------------------------------------------------------------------------
def reference_forward(last_y, last_o, last_h, last_c, v, p):
    H = last_h.shape[1]
    linear_trans = ((last_h @ p["wh_w"] + p["wh_b"])[:, None, :]
                    + jnp.einsum("bsh,ha->bsa", v, p["wv_w"]) + p["wv_b"])
    e = jnp.sum(jnp.tanh(linear_trans) * p["beta_w"][0], axis=-1) + p["beta_b"][0, 0]
    alpha = jax.nn.softmax(e, axis=1)
    c_i = jnp.sum(alpha[:, :, None] * v, axis=1)
    embedded = p["emb"][last_y]
    x = jnp.concatenate([embedded, last_o], axis=1)
    gates = x @ p["w_ih"] + p["b_ih"] + last_h @ p["w_hh"] + p["b_hh"]
    i_g = jax.nn.sigmoid(gates[:, :H])
    f_g = jax.nn.sigmoid(gates[:, H:2 * H])
    g_g = jnp.tanh(gates[:, 2 * H:3 * H])
    o_g = jax.nn.sigmoid(gates[:, 3 * H:])
    c_t = f_g * last_c + i_g * g_g
    h_t = o_g * jnp.tanh(c_t)
    o_t = jnp.tanh(h_t @ p["wc1_w"] + p["wc1_b"] + c_i @ p["wc2_w"] + p["wc2_b"])
    logits = o_t @ p["wout_w"] + p["wout_b"]
    prob = jax.nn.log_softmax(logits, axis=1)
    return prob, o_t, h_t, c_t


if __name__ == "__main__":
    num_tokens, embedding_dim, hidden_dim, output_dim, attn_dim = 32, 16, 32, 16, 16
    B, S = 2, 8

    key = jax.random.PRNGKey(0)
    kp, k1, k2, k3, k4, k5 = jax.random.split(key, 6)
    params = make_params(kp, num_tokens, embedding_dim, hidden_dim, output_dim, attn_dim)
    packed = pack_params(params)

    last_y = jax.random.randint(k1, (B,), 0, num_tokens, dtype=jnp.int32)
    last_o = jax.random.normal(k2, (B, output_dim), jnp.float32)
    last_h = jax.random.normal(k3, (B, hidden_dim), jnp.float32)
    last_c = jax.random.normal(k4, (B, hidden_dim), jnp.float32)
    v = jax.random.normal(k5, (B, S, hidden_dim), jnp.float32)

    outs = attn_decoder_forward(last_y, last_o, last_h, last_c, v, packed)
    outs = jax.block_until_ready(outs)

    refs = reference_forward(last_y, last_o, last_h, last_c, v, params)
    names = ("prob", "o_t", "h_t", "c_memory_t")
    # Tolerance slightly loosened vs. exact f32 because the softmax denominator
    # uses the EUP approximate reciprocal (gates use exact tanh-form sigmoid).
    for name, got, want in zip(names, outs, refs):
        assert got.shape == want.shape, (name, got.shape, want.shape)
        assert jnp.allclose(got, want, atol=5e-3, rtol=5e-3), name

    print("KERNEL_OK")
</pallas_src>

<mosaic_0001>
module attributes {stable_mosaic.version = 11 : i64} {
  func.func @attn_decoder_kernel(%arg0: i32, %arg1: memref<2x1xi32, #tpu.memory_space<vmem>>, %arg2: memref<2x16xf32, #tpu.memory_space<vmem>>, %arg3: memref<2x32xf32, #tpu.memory_space<vmem>>, %arg4: memref<2x32xf32, #tpu.memory_space<vmem>>, %arg5: memref<2x8x32xf32, #tpu.memory_space<vmem>>, %arg6: memref<32x16xf32, #tpu.memory_space<vmem>>, %arg7: memref<64x16xf32, #tpu.memory_space<vmem>>, %arg8: memref<64x128xf32, #tpu.memory_space<vmem>>, %arg9: memref<64x16xf32, #tpu.memory_space<vmem>>, %arg10: memref<16x32xf32, #tpu.memory_space<vmem>>, %arg11: memref<5x128xf32, #tpu.memory_space<vmem>>, %arg12: memref<2x128xf32, #tpu.memory_space<vmem>>, %arg13: memref<2x64xf32, #tpu.memory_space<vmem>>, %arg14: memref<2x64xf32, #tpu.memory_space<vmem>>) attributes {dimension_semantics = [#tpu.dimension_semantics<parallel>], iteration_bounds = array<i64: 1>, scalar_prefetch = 0 : i64, scratch_operands = 2 : i64, tpu.core_type = #tpu.core_type<tc>, window_params = [{transform_indices = @transform_0, window_bounds = array<i64: 2, 1>}, {transform_indices = @transform_1, window_bounds = array<i64: 2, 16>}, {transform_indices = @transform_2, window_bounds = array<i64: 2, 32>}, {transform_indices = @transform_3, window_bounds = array<i64: 2, 32>}, {transform_indices = @transform_4, window_bounds = array<i64: 2, 8, 32>}, {pipeline_mode = #tpu.pipeline_mode<synchronous>, transform_indices = @transform_5, window_bounds = array<i64: 32, 16>}, {pipeline_mode = #tpu.pipeline_mode<synchronous>, transform_indices = @transform_6, window_bounds = array<i64: 64, 16>}, {pipeline_mode = #tpu.pipeline_mode<synchronous>, transform_indices = @transform_7, window_bounds = array<i64: 64, 128>}, {pipeline_mode = #tpu.pipeline_mode<synchronous>, transform_indices = @transform_8, window_bounds = array<i64: 64, 16>}, {pipeline_mode = #tpu.pipeline_mode<synchronous>, transform_indices = @transform_9, window_bounds = array<i64: 16, 32>}, {pipeline_mode = #tpu.pipeline_mode<synchronous>, transform_indices = @transform_10, window_bounds = array<i64: 5, 128>}, {transform_indices = @transform_11, window_bounds = array<i64: 2, 128>}]} {
    %c0 = arith.constant 0 : index
    %c0_0 = arith.constant 0 : index
    %0 = vector.load %arg3[%c0, %c0_0] : memref<2x32xf32, #tpu.memory_space<vmem>>, vector<2x32xf32>
    %c0_1 = arith.constant 0 : index
    %c0_2 = arith.constant 0 : index
    %1 = vector.load %arg4[%c0_1, %c0_2] : memref<2x32xf32, #tpu.memory_space<vmem>>, vector<2x32xf32>
    %c0_3 = arith.constant 0 : index
    %c0_4 = arith.constant 0 : index
    %2 = vector.load %arg2[%c0_3, %c0_4] : memref<2x16xf32, #tpu.memory_space<vmem>>, vector<2x16xf32>
    %c0_5 = arith.constant 0 : index
    %c0_6 = arith.constant 0 : index
    %c0_7 = arith.constant 0 : index
    %3 = vector.load %arg5[%c0_5, %c0_6, %c0_7] : memref<2x8x32xf32, #tpu.memory_space<vmem>>, vector<2x8x32xf32>
    %c0_8 = arith.constant 0 : index
    %c0_9 = arith.constant 0 : index
    %4 = vector.load %arg11[%c0_8, %c0_9] : memref<5x128xf32, #tpu.memory_space<vmem>>, vector<1x128xf32>
    %c1 = arith.constant 1 : index
    %c0_10 = arith.constant 0 : index
    %5 = vector.load %arg11[%c1, %c0_10] : memref<5x128xf32, #tpu.memory_space<vmem>>, vector<1x16xf32>
    %c2 = arith.constant 2 : index
    %c0_11 = arith.constant 0 : index
    %6 = vector.load %arg11[%c2, %c0_11] : memref<5x128xf32, #tpu.memory_space<vmem>>, vector<1x32xf32>
    %c3 = arith.constant 3 : index
    %c0_12 = arith.constant 0 : index
    %7 = vector.load %arg11[%c3, %c0_12] : memref<5x128xf32, #tpu.memory_space<vmem>>, vector<1x16xf32>
    %c4 = arith.constant 4 : index
    %c0_13 = arith.constant 0 : index
    %8 = vector.load %arg11[%c4, %c0_13] : memref<5x128xf32, #tpu.memory_space<vmem>>, vector<1x16xf32>
    %c0_14 = arith.constant 0 : index
    %c0_15 = arith.constant 0 : index
    %9 = vector.load %arg7[%c0_14, %c0_15] : memref<64x16xf32, #tpu.memory_space<vmem>>, vector<32x16xf32>
    %cst = arith.constant dense<0.000000e+00> : vector<2x16xf32>
    %10 = tpu.matmul %0, %9, %cst {dimension_numbers = #tpu.dot_dimension_numbers<[1], [0], [0], [1], [0, 0, 1, 1], [], []>} : vector<2x32xf32>, vector<32x16xf32>, vector<2x16xf32> -> vector<2x16xf32>
    %11 = vector.shape_cast %3 : vector<2x8x32xf32> to vector<16x32xf32>
    %c32 = arith.constant 32 : index
    %c0_16 = arith.constant 0 : index
    %12 = vector.load %arg7[%c32, %c0_16] : memref<64x16xf32, #tpu.memory_space<vmem>>, vector<32x16xf32>
    %cst_17 = arith.constant dense<0.000000e+00> : vector<16x16xf32>
    %13 = tpu.matmul %11, %12, %cst_17 {dimension_numbers = #tpu.dot_dimension_numbers<[1], [0], [0], [1], [0, 0, 1, 1], [], []>} : vector<16x32xf32>, vector<32x16xf32>, vector<16x16xf32> -> vector<16x16xf32>
    %14 = vector.broadcast %7 : vector<1x16xf32> to vector<16x16xf32>
    %15 = arith.addf %13, %14 : vector<16x16xf32>
    %16 = vector.shape_cast %15 : vector<16x16xf32> to vector<2x8x16xf32>
    %17 = vector.shape_cast %10 : vector<2x16xf32> to vector<2x1x16xf32>
    %18 = vector.broadcast %17 : vector<2x1x16xf32> to vector<2x8x16xf32>
    %19 = arith.addf %16, %18 : vector<2x8x16xf32>
    %20 = math.tanh %19 : vector<2x8x16xf32>
    %21 = vector.shape_cast %8 : vector<1x16xf32> to vector<1x1x16xf32>
    %22 = vector.broadcast %21 : vector<1x1x16xf32> to vector<2x8x16xf32>
    %23 = arith.mulf %20, %22 : vector<2x8x16xf32>
    %cst_18 = arith.constant dense<0.000000e+00> : vector<2x8xf32>
    %24 = vector.multi_reduction <add>, %23, %cst_18 [2] : vector<2x8x16xf32> to vector<2x8xf32>
    %cst_19 = arith.constant dense<0xFF800000> : vector<2xf32>
    %25 = vector.multi_reduction <maximumf>, %24, %cst_19 [1] : vector<2x8xf32> to vector<2xf32>
    %26 = vector.shape_cast %25 : vector<2xf32> to vector<2x1xf32>
    %27 = vector.broadcast %26 : vector<2x1xf32> to vector<2x8xf32>
    %28 = arith.subf %24, %27 : vector<2x8xf32>
    %29 = math.exp %28 : vector<2x8xf32>
    %cst_20 = arith.constant dense<0.000000e+00> : vector<2xf32>
    %30 = vector.multi_reduction <add>, %29, %cst_20 [1] : vector<2x8xf32> to vector<2xf32>
    %31 = vector.shape_cast %30 : vector<2xf32> to vector<2x1xf32>
    %32 = tpu.reciprocal %31 {approx = true} : vector<2x1xf32> -> vector<2x1xf32>
    %33 = vector.broadcast %32 : vector<2x1xf32> to vector<2x8xf32>
    %34 = arith.mulf %29, %33 : vector<2x8xf32>
    %35 = vector.shape_cast %34 : vector<2x8xf32> to vector<2x8x1xf32>
    %36 = vector.broadcast %35 : vector<2x8x1xf32> to vector<2x8x32xf32>
    %37 = arith.mulf %36, %3 : vector<2x8x32xf32>
    %cst_21 = arith.constant dense<0.000000e+00> : vector<2x32xf32>
    %38 = vector.multi_reduction <add>, %37, %cst_21 [1] : vector<2x8x32xf32> to vector<2x32xf32>
    %c0_22 = arith.constant 0 : index
    %c0_23 = arith.constant 0 : index
    %39 = vector.load %arg1[%c0_22, %c0_23] : memref<2x1xi32, #tpu.memory_space<vmem>>, vector<2x1xi32>
    %40 = tpu.iota {dimensions = array<i32: 1>} : vector<2x32xi32>
    %41 = vector.broadcast %39 : vector<2x1xi32> to vector<2x32xi32>
    %42 = arith.cmpi eq, %41, %40 : vector<2x32xi32>
    %43 = arith.extui %42 : vector<2x32xi1> to vector<2x32xi32>
    %44 = arith.sitofp %43 : vector<2x32xi32> to vector<2x32xf32>
    %c0_24 = arith.constant 0 : index
    %c0_25 = arith.constant 0 : index
    %45 = vector.load %arg6[%c0_24, %c0_25] : memref<32x16xf32, #tpu.memory_space<vmem>>, vector<32x16xf32>
    %cst_26 = arith.constant dense<0.000000e+00> : vector<2x16xf32>
    %46 = tpu.matmul %44, %45, %cst_26 {dimension_numbers = #tpu.dot_dimension_numbers<[1], [0], [0], [1], [0, 0, 1, 1], [], []>} : vector<2x32xf32>, vector<32x16xf32>, vector<2x16xf32> -> vector<2x16xf32>
    %c0_27 = arith.constant 0 : index
    %c0_28 = arith.constant 0 : index
    %47 = vector.load %arg13[%c0_27, %c0_28] : memref<2x64xf32, #tpu.memory_space<vmem>>, vector<2x16xf32>
    tpu.vector_store %arg13[%c0_27, %c0_28], %46 {strides = array<i32>} : memref<2x64xf32, #tpu.memory_space<vmem>>, vector<2x16xf32>,
    %c0_29 = arith.constant 0 : index
    %c16 = arith.constant 16 : index
    %48 = vector.load %arg13[%c0_29, %c16] : memref<2x64xf32, #tpu.memory_space<vmem>>, vector<2x16xf32>
    tpu.vector_store %arg13[%c0_29, %c16], %2 {strides = array<i32>} : memref<2x64xf32, #tpu.memory_space<vmem>>, vector<2x16xf32>,
    %c0_30 = arith.constant 0 : index
    %c32_31 = arith.constant 32 : index
    %49 = vector.load %arg13[%c0_30, %c32_31] : memref<2x64xf32, #tpu.memory_space<vmem>>, vector<2x32xf32>
    tpu.vector_store %arg13[%c0_30, %c32_31], %0 {strides = array<i32>} : memref<2x64xf32, #tpu.memory_space<vmem>>, vector<2x32xf32>,
    %c0_32 = arith.constant 0 : index
    %c0_33 = arith.constant 0 : index
    %50 = vector.load %arg13[%c0_32, %c0_33] : memref<2x64xf32, #tpu.memory_space<vmem>>, vector<2x64xf32>
    %c0_34 = arith.constant 0 : index
    %c0_35 = arith.constant 0 : index
    %51 = vector.load %arg8[%c0_34, %c0_35] : memref<64x128xf32, #tpu.memory_space<vmem>>, vector<64x128xf32>
    %cst_36 = arith.constant dense<0.000000e+00> : vector<2x128xf32>
    %52 = tpu.matmul %50, %51, %cst_36 {dimension_numbers = #tpu.dot_dimension_numbers<[1], [0], [0], [1], [0, 0, 1, 1], [], []>} : vector<2x64xf32>, vector<64x128xf32>, vector<2x128xf32> -> vector<2x128xf32>
    %53 = vector.broadcast %4 : vector<1x128xf32> to vector<2x128xf32>
    %54 = arith.addf %52, %53 : vector<2x128xf32>
    %55 = vector.extract_strided_slice %54 {offsets = [0, 0], sizes = [2, 32], strides = [1, 1]} : vector<2x128xf32> to vector<2x32xf32>
    %cst_37 = arith.constant 5.000000e-01 : f32
    %56 = vector.broadcast %cst_37 : f32 to vector<2x32xf32>
    %57 = arith.mulf %56, %55 : vector<2x32xf32>
    %58 = math.tanh %57 : vector<2x32xf32>
    %cst_38 = arith.constant 5.000000e-01 : f32
    %59 = vector.broadcast %cst_38 : f32 to vector<2x32xf32>
    %60 = arith.mulf %59, %58 : vector<2x32xf32>
    %cst_39 = arith.constant 5.000000e-01 : f32
    %61 = vector.broadcast %cst_39 : f32 to vector<2x32xf32>
    %62 = arith.addf %60, %61 : vector<2x32xf32>
    %63 = vector.extract_strided_slice %54 {offsets = [0, 32], sizes = [2, 32], strides = [1, 1]} : vector<2x128xf32> to vector<2x32xf32>
    %cst_40 = arith.constant 5.000000e-01 : f32
    %64 = vector.broadcast %cst_40 : f32 to vector<2x32xf32>
    %65 = arith.mulf %64, %63 : vector<2x32xf32>
    %66 = math.tanh %65 : vector<2x32xf32>
    %cst_41 = arith.constant 5.000000e-01 : f32
    %67 = vector.broadcast %cst_41 : f32 to vector<2x32xf32>
    %68 = arith.mulf %67, %66 : vector<2x32xf32>
    %cst_42 = arith.constant 5.000000e-01 : f32
    %69 = vector.broadcast %cst_42 : f32 to vector<2x32xf32>
    %70 = arith.addf %68, %69 : vector<2x32xf32>
    %71 = vector.extract_strided_slice %54 {offsets = [0, 64], sizes = [2, 32], strides = [1, 1]} : vector<2x128xf32> to vector<2x32xf32>
    %72 = math.tanh %71 : vector<2x32xf32>
    %73 = vector.extract_strided_slice %54 {offsets = [0, 96], sizes = [2, 32], strides = [1, 1]} : vector<2x128xf32> to vector<2x32xf32>
    %cst_43 = arith.constant 5.000000e-01 : f32
    %74 = vector.broadcast %cst_43 : f32 to vector<2x32xf32>
    %75 = arith.mulf %74, %73 : vector<2x32xf32>
    %76 = math.tanh %75 : vector<2x32xf32>
    %cst_44 = arith.constant 5.000000e-01 : f32
    %77 = vector.broadcast %cst_44 : f32 to vector<2x32xf32>
    %78 = arith.mulf %77, %76 : vector<2x32xf32>
    %cst_45 = arith.constant 5.000000e-01 : f32
    %79 = vector.broadcast %cst_45 : f32 to vector<2x32xf32>
    %80 = arith.addf %78, %79 : vector<2x32xf32>
    %81 = arith.mulf %70, %1 : vector<2x32xf32>
    %82 = arith.mulf %62, %72 : vector<2x32xf32>
    %83 = arith.addf %81, %82 : vector<2x32xf32>
    %84 = math.tanh %83 : vector<2x32xf32>
    %85 = arith.mulf %80, %84 : vector<2x32xf32>
    %c0_46 = arith.constant 0 : index
    %c0_47 = arith.constant 0 : index
    %86 = vector.load %arg14[%c0_46, %c0_47] : memref<2x64xf32, #tpu.memory_space<vmem>>, vector<2x32xf32>
    tpu.vector_store %arg14[%c0_46, %c0_47], %85 {strides = array<i32>} : memref<2x64xf32, #tpu.memory_space<vmem>>, vector<2x32xf32>,
    %c0_48 = arith.constant 0 : index
    %c32_49 = arith.constant 32 : index
    %87 = vector.load %arg14[%c0_48, %c32_49] : memref<2x64xf32, #tpu.memory_space<vmem>>, vector<2x32xf32>
    tpu.vector_store %arg14[%c0_48, %c32_49], %38 {strides = array<i32>} : memref<2x64xf32, #tpu.memory_space<vmem>>, vector<2x32xf32>,
    %c0_50 = arith.constant 0 : index
    %c0_51 = arith.constant 0 : index
    %88 = vector.load %arg14[%c0_50, %c0_51] : memref<2x64xf32, #tpu.memory_space<vmem>>, vector<2x64xf32>
    %c0_52 = arith.constant 0 : index
    %c0_53 = arith.constant 0 : index
    %89 = vector.load %arg9[%c0_52, %c0_53] : memref<64x16xf32, #tpu.memory_space<vmem>>, vector<64x16xf32>
    %cst_54 = arith.constant dense<0.000000e+00> : vector<2x16xf32>
    %90 = tpu.matmul %88, %89, %cst_54 {dimension_numbers = #tpu.dot_dimension_numbers<[1], [0], [0], [1], [0, 0, 1, 1], [], []>} : vector<2x64xf32>, vector<64x16xf32>, vector<2x16xf32> -> vector<2x16xf32>
    %91 = vector.broadcast %5 : vector<1x16xf32> to vector<2x16xf32>
    %92 = arith.addf %90, %91 : vector<2x16xf32>
    %93 = math.tanh %92 : vector<2x16xf32>
    %c0_55 = arith.constant 0 : index
    %c0_56 = arith.constant 0 : index
    %94 = vector.load %arg10[%c0_55, %c0_56] : memref<16x32xf32, #tpu.memory_space<vmem>>, vector<16x32xf32>
    %cst_57 = arith.constant dense<0.000000e+00> : vector<2x32xf32>
    %95 = tpu.matmul %93, %94, %cst_57 {dimension_numbers = #tpu.dot_dimension_numbers<[1], [0], [0], [1], [0, 0, 1, 1], [], []>} : vector<2x16xf32>, vector<16x32xf32>, vector<2x32xf32> -> vector<2x32xf32>
    %96 = vector.broadcast %6 : vector<1x32xf32> to vector<2x32xf32>
    %97 = arith.addf %95, %96 : vector<2x32xf32>
    %cst_58 = arith.constant dense<0xFF800000> : vector<2xf32>
    %98 = vector.multi_reduction <maximumf>, %97, %cst_58 [1] : vector<2x32xf32> to vector<2xf32>
    %99 = vector.shape_cast %98 : vector<2xf32> to vector<2x1xf32>
    %100 = vector.broadcast %99 : vector<2x1xf32> to vector<2x32xf32>
    %101 = arith.subf %97, %100 : vector<2x32xf32>
    %102 = math.exp %101 : vector<2x32xf32>
    %cst_59 = arith.constant dense<0.000000e+00> : vector<2xf32>
    %103 = vector.multi_reduction <add>, %102, %cst_59 [1] : vector<2x32xf32> to vector<2xf32>
    %104 = vector.shape_cast %103 : vector<2xf32> to vector<2x1xf32>
    %105 = math.log %104 : vector<2x1xf32>
    %106 = vector.broadcast %105 : vector<2x1xf32> to vector<2x32xf32>
    %107 = arith.subf %101, %106 : vector<2x32xf32>
    %c0_60 = arith.constant 0 : index
    %c0_61 = arith.constant 0 : index
    %108 = vector.load %arg12[%c0_60, %c0_61] : memref<2x128xf32, #tpu.memory_space<vmem>>, vector<2x32xf32>
    tpu.vector_store %arg12[%c0_60, %c0_61], %107 {strides = array<i32>} : memref<2x128xf32, #tpu.memory_space<vmem>>, vector<2x32xf32>,
    %c0_62 = arith.constant 0 : index
    %c32_63 = arith.constant 32 : index
    %109 = vector.load %arg12[%c0_62, %c32_63] : memref<2x128xf32, #tpu.memory_space<vmem>>, vector<2x16xf32>
    tpu.vector_store %arg12[%c0_62, %c32_63], %93 {strides = array<i32>} : memref<2x128xf32, #tpu.memory_space<vmem>>, vector<2x16xf32>,
    %c0_64 = arith.constant 0 : index
    %c48 = arith.constant 48 : index
    %110 = vector.load %arg12[%c0_64, %c48] : memref<2x128xf32, #tpu.memory_space<vmem>>, vector<2x32xf32>
    tpu.vector_store %arg12[%c0_64, %c48], %85 {strides = array<i32>} : memref<2x128xf32, #tpu.memory_space<vmem>>, vector<2x32xf32>,
    %c0_65 = arith.constant 0 : index
    %c80 = arith.constant 80 : index
    %111 = vector.load %arg12[%c0_65, %c80] : memref<2x128xf32, #tpu.memory_space<vmem>>, vector<2x32xf32>
    tpu.vector_store %arg12[%c0_65, %c80], %83 {strides = array<i32>} : memref<2x128xf32, #tpu.memory_space<vmem>>, vector<2x32xf32>,
    %cst_66 = arith.constant 0.000000e+00 : f32
    %112 = vector.broadcast %cst_66 : f32 to vector<2x16xf32>
    %c0_67 = arith.constant 0 : index
    %c112 = arith.constant 112 : index
    %113 = vector.load %arg12[%c0_67, %c112] : memref<2x128xf32, #tpu.memory_space<vmem>>, vector<2x16xf32>
    tpu.vector_store %arg12[%c0_67, %c112], %112 {strides = array<i32>} : memref<2x128xf32, #tpu.memory_space<vmem>>, vector<2x16xf32>,
    return
  }
  func.func @transform_0(%arg0: i32) -> (i32, i32) {
    %c0_i32 = arith.constant 0 : i32
    %c0_i32_0 = arith.constant 0 : i32
    return %arg0, %c0_i32 : i32, i32
  }
  func.func @transform_1(%arg0: i32) -> (i32, i32) {
    %c0_i32 = arith.constant 0 : i32
    %c0_i32_0 = arith.constant 0 : i32
    return %arg0, %c0_i32 : i32, i32
  }
  func.func @transform_2(%arg0: i32) -> (i32, i32) {
    %c0_i32 = arith.constant 0 : i32
    %c0_i32_0 = arith.constant 0 : i32
    return %arg0, %c0_i32 : i32, i32
  }
  func.func @transform_3(%arg0: i32) -> (i32, i32) {
    %c0_i32 = arith.constant 0 : i32
    %c0_i32_0 = arith.constant 0 : i32
    return %arg0, %c0_i32 : i32, i32
  }
  func.func @transform_4(%arg0: i32) -> (i32, i32, i32) {
    %c0_i32 = arith.constant 0 : i32
    %c0_i32_0 = arith.constant 0 : i32
    %c0_i32_1 = arith.constant 0 : i32
    return %arg0, %c0_i32, %c0_i32_0 : i32, i32, i32
  }
  func.func @transform_5(%arg0: i32) -> (i32, i32) {
    %c0_i32 = arith.constant 0 : i32
    %c0_i32_0 = arith.constant 0 : i32
    %c0_i32_1 = arith.constant 0 : i32
    return %c0_i32, %c0_i32_0 : i32, i32
  }
  func.func @transform_6(%arg0: i32) -> (i32, i32) {
    %c0_i32 = arith.constant 0 : i32
    %c0_i32_0 = arith.constant 0 : i32
    %c0_i32_1 = arith.constant 0 : i32
    return %c0_i32, %c0_i32_0 : i32, i32
  }
  func.func @transform_7(%arg0: i32) -> (i32, i32) {
    %c0_i32 = arith.constant 0 : i32
    %c0_i32_0 = arith.constant 0 : i32
    %c0_i32_1 = arith.constant 0 : i32
    return %c0_i32, %c0_i32_0 : i32, i32
  }
  func.func @transform_8(%arg0: i32) -> (i32, i32) {
    %c0_i32 = arith.constant 0 : i32
    %c0_i32_0 = arith.constant 0 : i32
    %c0_i32_1 = arith.constant 0 : i32
    return %c0_i32, %c0_i32_0 : i32, i32
  }
  func.func @transform_9(%arg0: i32) -> (i32, i32) {
    %c0_i32 = arith.constant 0 : i32
    %c0_i32_0 = arith.constant 0 : i32
    %c0_i32_1 = arith.constant 0 : i32
    return %c0_i32, %c0_i32_0 : i32, i32
  }
  func.func @transform_10(%arg0: i32) -> (i32, i32) {
    %c0_i32 = arith.constant 0 : i32
    %c0_i32_0 = arith.constant 0 : i32
    %c0_i32_1 = arith.constant 0 : i32
    return %c0_i32, %c0_i32_0 : i32, i32
  }
  func.func @transform_11(%arg0: i32) -> (i32, i32) {
    %c0_i32 = arith.constant 0 : i32
    %c0_i32_0 = arith.constant 0 : i32
    return %arg0, %c0_i32 : i32, i32
  }
}

</mosaic_0001>

<bundles_post_ra>
// kernel: tpu_custom_call.1
= control target key start
LH: loop header
LB: loop body
LE: loop exit
PB: predicated region body
PF: predicated region fallthrough
CT: control target
= control target key end

     0   :  { %v503_v3 = vmov 0   ;;  %vm53_vm0 = vcmask 261120   ;;  %s504_s19 = smov 32   ;;  %s748_s0 = inlined_call_operand.vmem [shape: s32[2,1], index: 0, kind: input, shape index: {}]   ;;  %s749_s1 = inlined_call_operand.vmem [shape: f32[2,16], index: 1, kind: input, shape index: {}]   ;;  %s750_s2 = inlined_call_operand.vmem [shape: f32[2,32], index: 2, kind: input, shape index: {}]   ;;  %s751_s3 = inlined_call_operand.vmem [shape: f32[2,32], index: 3, kind: input, shape index: {}]   ;;  %s752_s4 = inlined_call_operand.vmem [shape: f32[2,8,32], index: 4, kind: input, shape index: {}]   ;;  %s753_s5 = inlined_call_operand.vmem [shape: f32[32,16], index: 5, kind: input, shape index: {}]   ;;  %s754_s6 = inlined_call_operand.vmem [shape: f32[64,16], index: 6, kind: input, shape index: {}]   ;;  %s755_s7 = inlined_call_operand.vmem [shape: f32[64,128], index: 7, kind: input, shape index: {}]   ;;  %s756_s8 = inlined_call_operand.vmem [shape: f32[64,16], index: 8, kind: input, shape index: {}]   ;;  %s757_s9 = inlined_call_operand.vmem [shape: f32[16,32], index: 9, kind: input, shape index: {}]   ;;  %s758_s10 = inlined_call_operand.vmem [shape: f32[5,128], index: 10, kind: input, shape index: {}]   ;;  %s759_s11 = inlined_call_operand.hbm [shape: f32[2,128], index: 11, kind: output, shape index: {}]  }
   0x1   :  { %v52_v0 = vld [vmem:[%s754_s6 + $0x18] sm:$0xff]  ;;  %v204_v2 = vld [vmem:[%s748_s0] sm:$0x3]  ;;  %447 = vset.pattern.permute.xlu0 %v503_v3  ;;  %v51_v4 = vld [vmem:[%s754_s6 + $0x10] sm:$0xff]  ;;  %448 = vset.pattern.permute.xlu2 %v503_v3 }
   0x2   :  { %v80_v1 = vld [vmem:[%s754_s6 + $0x38] sm:$0xff]  ;;  %69 = vmatpush.msra.mxu0 %v52_v0  ;;  %v79_v5 = vld [vmem:[%s754_s6 + $0x30] sm:$0xff]  ;;  %206 = vperm.xlu0 %447, %v204_v2   ;;  %v50_v6 = vld [vmem:[%s754_s6 + $0x8] sm:$0xff] }
   0x3   :  { %100 = vmatpush.msra.mxu1 %v80_v1  ;;  %v78_v7 = vld [vmem:[%s754_s6 + $0x28] sm:$0xff]  ;;  %v49_v8 = vld [vmem:[%s754_s6] sm:$0xff]  ;;  %v214_v12 = vld [vmem:[%s753_s5 + $0x18] sm:$0xff]  ;;  %449 = vset.pattern.permute.xlu1 %v503_v3 }
   0x4   :  { %70 = vmatpush.msra.mxu0 %v51_v4  ;;  %v77_v9 = vld [vmem:[%s754_s6 + $0x20] sm:$0xff]  ;;  %v213_v13 = vld [vmem:[%s753_s5 + $0x10] sm:$0xff]  ;;  %v212_v14 = vld [vmem:[%s753_s5 + $0x8] sm:$0xff]  ;;  %230 = vmatpush.msra.mxu2 %v214_v12 }
   0x5   :  { %v39_v10 = vld [vmem:[%s750_s2] sm:$0x3]  ;;  %101 = vmatpush.msra.mxu1 %v79_v5 }
   0x6   :  { %v604_v11 = vld [vmem:[%s752_s4] sm:$0xff]  ;;  %246 = vrot.lane.b32.xlu1 %v39_v10, %s504_s19  ;;  %71 = vmatpush.msra.mxu0 %v50_v6 }
   0x7   :  { %102 = vmatpush.msra.mxu1 %v78_v7 }
   0x8   :  { %16 = vsyncpa [#allocation5], 0  ;;  %72 = vmatpush.msra.mxu0 %v49_v8  ;;  %231 = vmatpush.msra.mxu2 %v213_v13  ;;  %v622_v15 = vld [vmem:[%s752_s4 + $0x8] sm:$0xff]  ;;  %v211_v16 = vld [vmem:[%s753_s5] sm:$0xff]  ;;  %s505_s30 = smov 16   ;;  %v133_v18 = vlaneseq  ;;  %v506_v21 = vmov 0.0  }
   0x9   :  { %103 = vmatpush.msra.mxu1 %v77_v9  ;;  %431 = vmatmul.msk.f32.vlgmr.msra.gmra.mxu0 %vm53_vm0, %v39_v10  ;;  %v41_v17 = vld [vmem:[%s749_s1] sm:$0x3]  ;;  %v259_v23 = vld [vmem:[%s755_s7 + $0x38] sm:$0xff]  ;;  %v258_v24 = vld [vmem:[%s755_s7 + $0x30] sm:$0xff]  ;;  %vm124_vm2 = vcmask 130048   ;;  %vm238_vm3 = vcmask 123904  }
   0xa   :  { %432 = vmatmul.msk.f32.vlgmr.msra.gmra.mxu1 %vm53_vm0, %v604_v11  ;;  %232 = vmatpush.msra.mxu2 %v212_v14  ;;  %v632_v19 = vand.u32 127, %v133_v18  ;;  %v450_v25 = vld [vmem:[%s758_s10 + $0x3] ss:$0 sm:$0xff]  ;;  %v451_v34 = vld [vmem:[%s758_s10 + $0x4] ss:$0 sm:$0xff]  ;;  %v257_v43 = vld [vmem:[%s755_s7 + $0x28] sm:$0xff] }
   0xb   :  { %241 = vrot.lane.b32.xlu0 %v41_v17, %s505_s30  ;;  %273 = vmatpush.msra.mxu3 %v259_v23  ;;  %v256_v44 = vld [vmem:[%s755_s7 + $0x20] sm:$0xff]  ;;  %v255_v45 = vld [vmem:[%s755_s7 + $0x18] sm:$0xff]  ;;  %v254_v46 = vld [vmem:[%s755_s7 + $0x10] sm:$0xff]  ;;  %vm244_vm4 = vcmask 255104   ;;  %vm249_vm5 = vcmask 517376   ;;  %vm261_vm6 = vcmask 523264  }
   0xc   :  { %233 = vmatpush.msra.mxu2 %v211_v16  ;;  %v253_v47 = vld [vmem:[%s755_s7 + $0x8] sm:$0xff]  ;;  %v252_v48 = vld [vmem:[%s755_s7] sm:$0xff]  ;;  %vm137_vm7 = vcmask 1041409   ;;  %vm140_vm8 = vcmask 58368   ;;  %s507_s30 = smov 64   ;;  %vm315_vm9 = vcmask 254976  }
   0xd   :  { %274 = vmatpush.msra.mxu3 %v258_v24  ;;  %v452_v2 = vld [vmem:[%s758_s10] ss:$0 sm:$0xff]  ;;  %s508_s7 = smov 80   ;;  %s509_s27 = smov 48   ;;  %vm400_vm10 = vcmask 386304   ;;  %vm405_vm11 = vcmask 648576  }
   0xe   :  { %v40_v7 = vld [vmem:[%s751_s3] sm:$0x3]  ;;  %s422_s3 = sshll.u32 %s759_s11, 4  ;;  %vm411_vm12 = vcmask 910976   ;;  %vm413_vm13 = vcmask 1042304   ;;  %s423_s3 = int_to_ptr.hbm [resolvable:$true] %s422_s3 }
   0xf   :  { %275 = vmatpush.msra.mxu3 %v257_v43 }
  0x11   :  { %276 = vmatpush.msra.mxu3 %v256_v44 }
  0x12   :  { %433 = vmatmul.msk.f32.gmra.mxu1 %vm53_vm0, %v622_v15 }
  0x13   :  { %277 = vmatpush.msra.mxu3 %v255_v45 }
  0x15   :  { %278 = vmatpush.msra.mxu3 %v254_v46 }
  0x17   :  { %279 = vmatpush.msra.mxu3 %v253_v47 }
  0x19   :  { %280 = vmatpush.msra.mxu3 %v252_v48 }
  0x74   :  { %v207_v20 = vpop.permute.xlu0 %206 }
  0x75   :  { %vm208_vm1 = vcmp.eq.s32.totalorder %v207_v20, %v632_v19 }
  0x76   :  { %v434_v22 = vsel %vm208_vm1, 1.0, %v506_v21 }
  0x77   :  { %435 = vmatmul.msk.f32.vlgmr.msra.gmra.mxu2 %vm53_vm0, %v434_v22 }
  0x78   :  { %v247_v51 = vpop.permute.xlu1 %246 }
  0x7d   :  { %v242_v49 = vpop.permute.xlu0 %241 }
  0x86   :  { %v74_v26 = vpop.f32.mrf.mxu0 }
  0x87   :  { %v113_v27 = vperm.slane %v74_v26, 0  ;;  %v105_v28 = vpop.f32.mrf.mxu1  ;;  %v112_v30 = vrot.slane %v74_v26, 1 }
  0x88   :  { %v106_v29 = vadd.f32 %v450_v25, %v105_v28 }
  0x89   :  { %v114_v32 = vperm.slane %v112_v30, 0 }
  0x8a   :  { %v117_v31 = vadd.f32 %v113_v27, %v106_v29 }
  0x8c   :  { %455 = vtanh.f32 %v117_v31 }
  0x8f   :  { %v108_v33 = vpop.f32.mrf.mxu1 }
  0x90   :  { %v109_v35 = vadd.f32 %v450_v25, %v108_v33 }
  0x92   :  { %v456_v36 = vpop.eup %455  ;;  %v118_v37 = vadd.f32 %v114_v32, %v109_v35 }
  0x93   :  { %v122_v38 = vmul.f32 %v456_v36, %v451_v34 }
  0x94   :  { %457 = vtanh.f32 %v118_v37 }
  0x95   :  { %v125_v39 = vsel %vm124_vm2, %v122_v38, 0.0 }
  0x96   :  { %126 = vadd.xlane.f32.xlu1 %v125_v39 }
  0x9a   :  { %v458_v40 = vpop.eup %457 }
  0x9b   :  { %v123_v41 = vmul.f32 %v458_v40, %v451_v34 }
  0x9d   :  { %v128_v42 = vsel %vm124_vm2, %v123_v41, 0.0 }
  0x9e   :  { %129 = vadd.xlane.f32.xlu2 %v128_v42 }
  0xfa   :  { %v235_v50 = vpop.f32.mrf.mxu2 }
  0xfb   :  { %239 = vst.msk [vmem:[#allocation2] sm:$0x3] %vm238_vm3, %v235_v50 }
  0xfc   :  { %245 = vst.msk [vmem:[#allocation2] sm:$0x3] %vm244_vm4, %v242_v49 }
  0xfd   :  { %250 = vst.msk [vmem:[#allocation2] sm:$0x3] %vm249_vm5, %v247_v51 }
 0x104   :  { %v251_v52 = vld [vmem:[#allocation2] sm:$0x3] }
 0x105   :  { %436 = vmatmul.msk.f32.vlgmr.msra.gmra.mxu3 %vm261_vm6, %v251_v52 }
 0x109   :  { %v127_v53 = vpop.xlane.xlu1 %126 }
 0x10a   :  { %v135_v55 = vperm.slane %v127_v53, %v632_v19 }
 0x111   :  { %v130_v54 = vpop.xlane.xlu2 %129 }
 0x112   :  { %v136_v56 = vperm.slane %v130_v54, %v632_v19 }
 0x114   :  { %v138_v57 = vsel %vm137_vm7, %v136_v56, %v135_v55  ;;  %v331_v55 = vld [vmem:[%s756_s8 + $0x30] sm:$0xff]  ;;  %v330_v56 = vld [vmem:[%s756_s8 + $0x28] sm:$0xff] }
 0x115   :  { %v141_v58 = vsel %vm140_vm8, %v138_v57, -inf  ;;  %v329_v57 = vld [vmem:[%s756_s8 + $0x20] sm:$0xff] }
 0x116   :  { %142 = vmax.xlane.f32.xlu2 %v141_v58 }
 0x188   :  { %v282_v3 = vpop.f32.mrf.mxu3 }
 0x189   :  { %v143_v59 = vpop.xlane.xlu2 %142  ;;  %v283_v4 = vadd.f32 %v452_v2, %v282_v3  ;;  %v358_v2 = vld [vmem:[%s757_s9] sm:$0xff] }
 0x18a   :  { %v145_v60 = vperm.slane %v143_v59, 0  ;;  %v146_v61 = vperm.slane %v143_v59, 1  ;;  %v328_v59 = vld [vmem:[%s756_s8 + $0x18] sm:$0xff]  ;;  %v453_v3 = vld [vmem:[%s758_s10 + $0x1] ss:$0 sm:$0xff] }
 0x18b   :  { %v285_v9 = vmul.f32 0.5, %v283_v4 }
 0x18c   :  { %v149_v62 = vsub.f32 %v127_v53, %v145_v60  ;;  %v150_v63 = vsub.f32 %v130_v54, %v146_v61  ;;  %v327_v60 = vld [vmem:[%s756_s8 + $0x10] sm:$0xff]  ;;  %v326_v61 = vld [vmem:[%s756_s8 + $0x8] sm:$0xff] }
 0x18e   :  { %v151_v0 = vmul.f32 1.442695, %v149_v62  ;;  %v153_v1 = vmul.f32 1.442695, %v150_v63  ;;  %v325_v62 = vld [vmem:[%s756_s8] sm:$0xff] }
 0x190   :  { %459 = vpow2.f32 %v151_v0 }
 0x191   :  { %461 = vpow2.f32 %v153_v1  ;;  %v359_v1 = vld [vmem:[%s757_s9 + $0x8] sm:$0xff] }
 0x192   :  { %463 = vtanh.f32 %v283_v4  ;;  %378 = vmatpush.msrb.mxu2 %v359_v1 }
 0x193   :  { %465 = vtanh.f32 %v285_v9 }
 0x194   :  { %379 = vmatpush.msrb.mxu2 %v358_v2 }
 0x196   :  { %v460_v5 = vpop.eup %459 }
 0x197   :  { %v462_v6 = vpop.eup %461  ;;  %158 = vperm.xlu0 %447, %v460_v5  }
 0x198   :  { %161 = vperm.xlu2 %448, %v462_v6   ;;  %v464_v8 = vpop.eup %463 }
 0x199   :  { %v466_v12 = vpop.eup %465 }
 0x19a   :  { %v287_v17 = vmul.f32 0.5, %v466_v12 }
 0x19c   :  { %v288_v22 = vadd.f32 0.5, %v287_v17 }
 0x19f   :  { %296 = vrot.lane.b32.xlu0 %v464_v8, %s507_s30 }
 0x1a0   :  { %291 = vrot.lane.b32.xlu2 %v40_v7, %s504_s19  ;;  %v454_v7 = vld [vmem:[%s758_s10 + $0x2] ss:$0 sm:$0xff]  ;;  %s510_s10 = smov [#allocation4]  }
 0x1f2   :  { %v162_v10 = vpop.permute.xlu2 %161 }
 0x1f3   :  { %v164_v14 = vperm.slane %v162_v10, %v632_v19 }
 0x1fa   :  { %v292_v25 = vpop.permute.xlu2 %291 }
 0x1fb   :  { %v294_v29 = vmul.f32 %v292_v25, %v288_v22 }
 0x209   :  { %v159_v13 = vpop.permute.xlu0 %158 }
 0x20a   :  { %v163_v16 = vperm.slane %v159_v13, %v632_v19 }
 0x20c   :  { %v165_v18 = vsel %vm137_vm7, %v164_v14, %v163_v16 }
 0x20d   :  { %v167_v20 = vsel %vm140_vm8, %v165_v18, 0.0 }
 0x20e   :  { %168 = vadd.xlane.f32.xlu0 %v167_v20 }
 0x211   :  { %v297_v23 = vpop.permute.xlu0 %296 }
 0x212   :  { %v299_v24 = vmul.f32 %v297_v23, %v288_v22 }
 0x214   :  { %301 = vrot.lane.b32.xlu2 %v299_v24, %s504_s19 }
 0x26e   :  { %v302_v27 = vpop.permute.xlu2 %301 }
 0x26f   :  { %v688_v19 = vadd.f32 %v302_v27, %v294_v29 }
 0x281   :  { %v169_v26 = vpop.xlane.xlu0 %168 }
 0x282   :  { %467 = vrcp.f32 %v169_v26 }
 0x283   :  { %469 = vtanh.f32 %v688_v19 }
 0x288   :  { %v468_v28 = vpop.eup %467 }
 0x289   :  { %v173_v30 = vperm.slane %v468_v28, 1  ;;  %v172_v31 = vperm.slane %v468_v28, 0  ;;  %v470_v34 = vpop.eup %469 }
 0x28b   :  { %v177_v32 = vmul.f32 %v462_v6, %v173_v30  ;;  %v176_v33 = vmul.f32 %v460_v5, %v172_v31 }
 0x28d   :  { %185 = vperm.xlu2 %448, %v177_v32   ;;  %180 = vperm.xlu1 %449, %v176_v33  }
 0x295   :  { %307 = vrot.lane.b32.xlu2 %v470_v34, %s507_s30 }
 0x2e7   :  { %v186_v35 = vpop.permute.xlu2 %185 }
 0x2e8   :  { %v189_v38 = vmul.f32 %v186_v35, %v622_v15 }
 0x2ea   :  { %v197_v39 = vsel %vm53_vm0, %v189_v38, 0.0 }
 0x2eb   :  { %v198_v40 = vrot.slane %v197_v39, 4 }
 0x2ed   :  { %v199_v41 = vadd.f32 %v198_v40, %v197_v39 }
 0x2ef   :  { %v308_v36 = vpop.permute.xlu2 %307  ;;  %v200_v44 = vrot.slane %v199_v41, 2 }
 0x2f0   :  { %v310_v37 = vmul.f32 %v308_v36, %v288_v22 }
 0x2f1   :  { %v201_v47 = vadd.f32 %v200_v44, %v199_v41 }
 0x2f2   :  { %312 = vrot.lane.b32.xlu2 %v310_v37, %s504_s19 }
 0x2f3   :  { %v202_v50 = vrot.slane %v201_v47, 1 }
 0x2f5   :  { %v203_v53 = vadd.f32 %v202_v50, %v201_v47 }
 0x2ff   :  { %v181_v42 = vpop.permute.xlu1 %180 }
 0x300   :  { %v188_v43 = vmul.f32 %v181_v42, %v604_v11  ;;  %v332_v11 = vld [vmem:[%s756_s8 + $0x38] sm:$0xff] }
 0x301   :  { %345 = vmatpush.msrb.mxu0 %v332_v11 }
 0x302   :  { %v190_v45 = vsel %vm53_vm0, %v188_v43, 0.0 }
 0x303   :  { %v191_v46 = vrot.slane %v190_v45, 4  ;;  %346 = vmatpush.msrb.mxu0 %v331_v55 }
 0x305   :  { %v192_v48 = vadd.f32 %v191_v46, %v190_v45  ;;  %347 = vmatpush.msrb.mxu0 %v330_v56 }
 0x307   :  { %v193_v49 = vrot.slane %v192_v48, 2  ;;  %348 = vmatpush.msrb.mxu0 %v329_v57 }
 0x309   :  { %v194_v51 = vadd.f32 %v193_v49, %v192_v48  ;;  %349 = vmatpush.msrb.mxu0 %v328_v59 }
 0x30b   :  { %v195_v52 = vrot.slane %v194_v51, 1  ;;  %350 = vmatpush.msrb.mxu0 %v327_v60 }
 0x30d   :  { %v196_v15 = vadd.f32 %v195_v52, %v194_v51  ;;  %351 = vmatpush.msrb.mxu0 %v326_v61 }
 0x30f   :  { %v319_v54 = vsel %vm137_vm7, %v203_v53, %v196_v15  ;;  %352 = vmatpush.msrb.mxu0 %v325_v62 }
 0x310   :  { %320 = vrot.lane.b32.xlu0 %v319_v54, %s504_s19 }
 0x34c   :  { %v313_v58 = vpop.permute.xlu2 %312 }
 0x34d   :  { %316 = vst.msk [vmem:[#allocation3] sm:$0x3] %vm315_vm9, %v313_v58 }
 0x382   :  { %v321_v63 = vpop.permute.xlu0 %320 }
 0x383   :  { %323 = vst.msk [vmem:[#allocation3] sm:$0x3] %vm249_vm5, %v321_v63 }
 0x38a   :  { %v324_v0 = vld [vmem:[#allocation3] sm:$0x3] }
 0x38b   :  { %437 = vmatmul.msk.f32.vlgmr.msrb.gmra.mxu0 %vm261_vm6, %v324_v0 }
 0x408   :  { %v354_v4 = vpop.f32.mrf.mxu0 }
 0x409   :  { %v355_v5 = vadd.f32 %v453_v3, %v354_v4 }
 0x40b   :  { %471 = vtanh.f32 %v355_v5 }
 0x411   :  { %v472_v6 = vpop.eup %471 }
 0x412   :  { %397 = vrot.lane.b32.xlu0 %v472_v6, %s504_s19  ;;  %438 = vmatmul.msk.f32.vlgmr.msrb.gmra.mxu2 %vm124_vm2, %v472_v6  ;;  %s420_s19 = sshll.u32 %s510_s10, 4  ;;  %s421_s19 = int_to_ptr.vmem [resolvable:$true] %s420_s19 }
 0x41a   :  { %402 = vrot.lane.b32.xlu0 %v310_v37, %s508_s7 }
 0x422   :  { %408 = vrot.lane.b32.xlu0 %v688_v19, %s509_s27 }
 0x484   :  { %v398_v18 = vpop.permute.xlu0 %397 }
 0x48c   :  { %v403_v22 = vpop.permute.xlu0 %402 }
 0x494   :  { %v409_v26 = vpop.permute.xlu0 %408 }
 0x495   :  { %v381_v8 = vpop.f32.mrf.mxu2 }
 0x496   :  { %v382_v9 = vadd.f32 %v454_v7, %v381_v8 }
 0x498   :  { %v384_v10 = vsel %vm315_vm9, %v382_v9, -inf }
 0x499   :  { %385 = vmax.xlane.f32.xlu1 %v384_v10 }
 0x50c   :  { %v386_v12 = vpop.xlane.xlu1 %385 }
 0x50d   :  { %v387_v13 = vsub.f32 %v382_v9, %v386_v12 }
 0x50f   :  { %v388_v14 = vmul.f32 1.442695, %v387_v13 }
 0x511   :  { %473 = vpow2.f32 %v388_v14 }
 0x517   :  { %v474_v16 = vpop.eup %473 }
 0x518   :  { %v390_v17 = vsel %vm315_vm9, %v474_v16, 0.0 }
 0x519   :  { %391 = vadd.xlane.f32.xlu2 %v390_v17 }
 0x58c   :  { %v392_v20 = vpop.xlane.xlu2 %391 }
 0x58d   :  { %475 = vlog2.f32 %v392_v20 }
 0x593   :  { %v476_v23 = vpop.eup %475 }
 0x594   :  { %v394_v24 = vmul.f32 0.6931472, %v476_v23 }
 0x596   :  { %v395_v25 = vsub.f32 %v387_v13, %v394_v24 }
 0x598   :  { %396 = vst.msk [vmem:[#allocation4] sm:$0x3] %vm315_vm9, %v395_v25 }
 0x599   :  { %401 = vst.msk [vmem:[#allocation4] sm:$0x3] %vm400_vm10, %v398_v18 }
 0x59a   :  { %406 = vst.msk [vmem:[#allocation4] sm:$0x3] %vm405_vm11, %v403_v22 }
 0x59b   :  { %412 = vst.msk [vmem:[#allocation4] sm:$0x3] %vm411_vm12, %v409_v26 }
 0x59c   :  { %414 = vst.msk [vmem:[#allocation4] sm:$0x3] %vm413_vm13, %v506_v21 }
 0x59d   :  { %425 = dma.vmem_to_hbm [thread:$0]  %s421_s19, 32, %s423_s3, [#allocation5]  }
 0x59e   :  { %501 = dma.done.wait [#allocation5], 32  }
 0x59f   :  { %502 = vsyncadd [#allocation5], 4294967264 }
 0x5a0   :  { %430 = vsyncpa [#allocation5], 1 }

</bundles_post_ra>
